<compile_context>
chip_gen: v5e
topology: v5e:2x2
jax: 0.10.0
libtpu: 0.0.40
codegen_flags: <defaults>
</compile_context>

<pallas_src>
import math

import jax
import jax.numpy as jnp
from jax import lax
from jax.experimental import pallas as pl
from jax.experimental.pallas import tpu as pltpu


def dqn_kernel(x_ref, w1_ref, b1_ref, w2t_ref, b2_ref, o_ref):
    # Cast x to bf16 in-kernel (hidden behind the x DMA); no wrapper-side pass.
    x = x_ref[...].astype(jnp.bfloat16)                      # (tb, in_f)

    # hidden = relu(x @ W1 + b1): MXU bf16 matmul, f32 accumulation + f32 epilogue.
    h = jnp.dot(x, w1_ref[...], preferred_element_type=jnp.float32)   # (tb, 128)
    h = jnp.maximum(h + b1_ref[...], 0.0)                    # b1 (1,128) sublane-bcast

    # out^T = W2^T @ h^T computed as an NT matmul: lhs (out_f, 128) and rhs
    # (tb, 128) both contract their lane dim -> (out_f, tb), a lane-dense tile.
    out = lax.dot_general(
        w2t_ref[...], h.astype(jnp.bfloat16),
        dimension_numbers=(((1,), (1,)), ((), ())),
        preferred_element_type=jnp.float32)                  # (out_f, tb)

    o_ref[...] = (out + b2_ref[...]).astype(o_ref.dtype)     # b2 (out_f,1) lane-bcast


def _round_up(x, m):
    return ((x + m - 1) // m) * m


def dqn_forward(x, w1, b1, w2, b2, *, block_b=4096):
    """relu(x @ w1 + b1) @ w2 + b2, fused in one Pallas call.

    x : (B, in_f)   any float dtype (kept as-is; cast to bf16 inside the kernel)
    w1: (in_f, 128)   b1: (1, 128)   w2: (128, out_f)   b2: (1, out_f)
    Returns f32 (B, out_f).
    """
    B, in_f = x.shape
    hidden = w1.shape[1]
    out_f = w2.shape[1]

    # Batch tiling. The kernel writes the output transposed as (out_f, B), so
    # with >1 tile the batch tile is the output's LANE dim and must be a
    # multiple of 128. Small batches use one full-extent tile (block dims ==
    # array dims: legal for any ragged B, no padding at all).
    if B < 256:
        tb = B
    else:
        # >=2 tiles so v7x's 2nd TensorCore is used; capped at block_b.
        tb = min(block_b, _round_up(pl.cdiv(B, 2), 128))
    n_tiles = pl.cdiv(B, tb)
    # Partial last tile: OOB x rows hold garbage but rows are independent and
    # the corresponding OOB output lanes are clipped on writeback.

    # Tiny one-time converts (MXU operands); biases stay f32 for the epilogue.
    w1c = w1.astype(jnp.bfloat16)                       # (in_f, hidden)
    w2t = w2.T.astype(jnp.bfloat16)                     # (out_f, hidden)  NT operand
    b1c = b1.reshape(1, hidden).astype(jnp.float32)
    b2c = b2.reshape(out_f, 1).astype(jnp.float32)      # matches (out_f, tb) tile

    out_t = pl.pallas_call(
        dqn_kernel,
        out_shape=jax.ShapeDtypeStruct((out_f, B), jnp.float32),
        grid_spec=pltpu.PrefetchScalarGridSpec(
            num_scalar_prefetch=0,
            grid=(n_tiles,),
            in_specs=[
                pl.BlockSpec((tb, in_f), lambda i: (i, 0)),        # x: streamed tile
                pl.BlockSpec((in_f, hidden), lambda i: (0, 0)),    # w1: VMEM-resident
                pl.BlockSpec((1, hidden), lambda i: (0, 0)),       # b1: VMEM-resident
                pl.BlockSpec((out_f, hidden), lambda i: (0, 0)),   # w2^T: VMEM-resident
                pl.BlockSpec((out_f, 1), lambda i: (0, 0)),        # b2: VMEM-resident
            ],
            out_specs=pl.BlockSpec((out_f, tb), lambda i: (0, i)),  # lane-dense store
        ),
        compiler_params=pltpu.CompilerParams(
            dimension_semantics=("parallel",),     # shards batch tiles across v7x TCs
            vmem_limit_bytes=32 * 1024 * 1024,
        ),
    )(x, w1c, b1c, w2t, b2c)

    # (out_f, B) -> (B, out_f). out_f == 8, so this is tiny vs. the x stream.
    return out_t.T


def init_params(key, input_feature, outputs_feature, hidden=128):
    """Deterministic init mirroring the PyTorch module:
    xavier_uniform_ on weights, default nn.Linear uniform(-1/sqrt(fan_in)) on biases."""
    k1, k2, k3, k4 = jax.random.split(key, 4)

    def xavier(k, fan_in, fan_out):
        bound = math.sqrt(6.0 / (fan_in + fan_out))
        # PyTorch weight shape is (out, in); we generate (in, out) directly
        # (same distribution, already transposed for x @ W).
        return jax.random.uniform(k, (fan_in, fan_out), jnp.float32, -bound, bound)

    def bias(k, fan_in, fan_out):
        bound = 1.0 / math.sqrt(fan_in)
        return jax.random.uniform(k, (1, fan_out), jnp.float32, -bound, bound)

    w1 = xavier(k1, input_feature, hidden)
    b1 = bias(k2, input_feature, hidden)
    w2 = xavier(k3, hidden, outputs_feature)
    b2 = bias(k4, hidden, outputs_feature)
    return w1, b1, w2, b2


def _reference(x, w1, b1, w2, b2):
    """Pure-JAX reference with the same precision policy as the kernel."""
    h = jnp.dot(x.astype(jnp.bfloat16), w1.astype(jnp.bfloat16),
                preferred_element_type=jnp.float32)
    h = jnp.maximum(h + b1, 0.0)
    o = jnp.dot(h.astype(jnp.bfloat16), w2.astype(jnp.bfloat16),
                preferred_element_type=jnp.float32)
    return o + b2


if __name__ == "__main__":
    input_feature = 32
    outputs_feature = 8

    key = jax.random.PRNGKey(0)
    kx, kp = jax.random.split(key)
    w1, b1, w2, b2 = init_params(kp, input_feature, outputs_feature)

    # aligned batch, ragged single-tile batch, ragged multi-tile (partial block) batch
    for batch in (8, 13, 300):
        x = jax.random.normal(jax.random.fold_in(kx, batch),
                              (batch, input_feature), jnp.float32)

        out = dqn_forward(x, w1, b1, w2, b2)
        jax.block_until_ready(out)
        assert out.shape == (batch, outputs_feature)

        # Matching-precision (bf16-in / f32-acc) reference: tight tolerance.
        ref_bf16 = _reference(x, w1, b1, w2, b2)
        assert jnp.allclose(out, ref_bf16, atol=2e-3, rtol=2e-3), (
            batch, float(jnp.max(jnp.abs(out - ref_bf16))))

        # Full-f32 reference: loose tolerance accounting for bf16 operand rounding.
        ref_f32 = jnp.maximum(x @ w1 + b1, 0.0) @ w2 + b2
        assert jnp.allclose(out, ref_f32, atol=5e-2, rtol=5e-2)

    print("KERNEL_OK")
</pallas_src>

<mosaic_0001>
module attributes {stable_mosaic.version = 11 : i64} {
  func.func @dqn_kernel(%arg0: i32, %arg1: memref<8x32xf32, #tpu.memory_space<vmem>>, %arg2: memref<32x128xbf16, #tpu.memory_space<vmem>>, %arg3: memref<1x128xf32, #tpu.memory_space<vmem>>, %arg4: memref<8x128xbf16, #tpu.memory_space<vmem>>, %arg5: memref<8x1xf32, #tpu.memory_space<vmem>>, %arg6: memref<8x8xf32, #tpu.memory_space<vmem>>) attributes {dimension_semantics = [#tpu.dimension_semantics<parallel>], iteration_bounds = array<i64: 1>, scalar_prefetch = 0 : i64, scratch_operands = 0 : i64, tpu.core_type = #tpu.core_type<tc>, window_params = [{transform_indices = @transform_0, window_bounds = array<i64: 8, 32>}, {pipeline_mode = #tpu.pipeline_mode<synchronous>, transform_indices = @transform_1, window_bounds = array<i64: 32, 128>}, {pipeline_mode = #tpu.pipeline_mode<synchronous>, transform_indices = @transform_2, window_bounds = array<i64: 1, 128>}, {pipeline_mode = #tpu.pipeline_mode<synchronous>, transform_indices = @transform_3, window_bounds = array<i64: 8, 128>}, {pipeline_mode = #tpu.pipeline_mode<synchronous>, transform_indices = @transform_4, window_bounds = array<i64: 8, 1>}, {transform_indices = @transform_5, window_bounds = array<i64: 8, 8>}]} {
    %c0 = arith.constant 0 : index
    %c0_0 = arith.constant 0 : index
    %0 = vector.load %arg1[%c0, %c0_0] : memref<8x32xf32, #tpu.memory_space<vmem>>, vector<8x32xf32>
    %1 = arith.truncf %0 : vector<8x32xf32> to vector<8x32xbf16>
    %c0_1 = arith.constant 0 : index
    %c0_2 = arith.constant 0 : index
    %2 = vector.load %arg2[%c0_1, %c0_2] : memref<32x128xbf16, #tpu.memory_space<vmem>>, vector<32x128xbf16>
    %cst = arith.constant dense<0.000000e+00> : vector<8x128xf32>
    %3 = tpu.matmul %1, %2, %cst {dimension_numbers = #tpu.dot_dimension_numbers<[1], [0], [0], [1], [0, 0, 1, 1], [], []>} : vector<8x32xbf16>, vector<32x128xbf16>, vector<8x128xf32> -> vector<8x128xf32>
    %c0_3 = arith.constant 0 : index
    %c0_4 = arith.constant 0 : index
    %4 = vector.load %arg3[%c0_3, %c0_4] : memref<1x128xf32, #tpu.memory_space<vmem>>, vector<1x128xf32>
    %5 = vector.broadcast %4 : vector<1x128xf32> to vector<8x128xf32>
    %6 = arith.addf %3, %5 : vector<8x128xf32>
    %cst_5 = arith.constant 0.000000e+00 : f32
    %7 = vector.broadcast %cst_5 : f32 to vector<8x128xf32>
    %8 = arith.maximumf %6, %7 : vector<8x128xf32>
    %c0_6 = arith.constant 0 : index
    %c0_7 = arith.constant 0 : index
    %9 = vector.load %arg4[%c0_6, %c0_7] : memref<8x128xbf16, #tpu.memory_space<vmem>>, vector<8x128xbf16>
    %10 = arith.truncf %8 : vector<8x128xf32> to vector<8x128xbf16>
    %cst_8 = arith.constant dense<0.000000e+00> : vector<8x8xf32>
    %11 = tpu.matmul %9, %10, %cst_8 {dimension_numbers = #tpu.dot_dimension_numbers<[1], [1], [0], [0], [0, 0, 1, 0], [], []>} : vector<8x128xbf16>, vector<8x128xbf16>, vector<8x8xf32> -> vector<8x8xf32>
    %c0_9 = arith.constant 0 : index
    %c0_10 = arith.constant 0 : index
    %12 = vector.load %arg5[%c0_9, %c0_10] : memref<8x1xf32, #tpu.memory_space<vmem>>, vector<8x1xf32>
    %13 = vector.broadcast %12 : vector<8x1xf32> to vector<8x8xf32>
    %14 = arith.addf %11, %13 : vector<8x8xf32>
    %c0_11 = arith.constant 0 : index
    %c0_12 = arith.constant 0 : index
    %15 = vector.load %arg6[%c0_11, %c0_12] : memref<8x8xf32, #tpu.memory_space<vmem>>, vector<8x8xf32>
    tpu.vector_store %arg6[%c0_11, %c0_12], %14 {strides = array<i32>} : memref<8x8xf32, #tpu.memory_space<vmem>>, vector<8x8xf32>,
    return
  }
  func.func @transform_0(%arg0: i32) -> (i32, i32) {
    %c0_i32 = arith.constant 0 : i32
    %c0_i32_0 = arith.constant 0 : i32
    return %arg0, %c0_i32 : i32, i32
  }
  func.func @transform_1(%arg0: i32) -> (i32, i32) {
    %c0_i32 = arith.constant 0 : i32
    %c0_i32_0 = arith.constant 0 : i32
    %c0_i32_1 = arith.constant 0 : i32
    return %c0_i32, %c0_i32_0 : i32, i32
  }
  func.func @transform_2(%arg0: i32) -> (i32, i32) {
    %c0_i32 = arith.constant 0 : i32
    %c0_i32_0 = arith.constant 0 : i32
    %c0_i32_1 = arith.constant 0 : i32
    return %c0_i32, %c0_i32_0 : i32, i32
  }
  func.func @transform_3(%arg0: i32) -> (i32, i32) {
    %c0_i32 = arith.constant 0 : i32
    %c0_i32_0 = arith.constant 0 : i32
    %c0_i32_1 = arith.constant 0 : i32
    return %c0_i32, %c0_i32_0 : i32, i32
  }
  func.func @transform_4(%arg0: i32) -> (i32, i32) {
    %c0_i32 = arith.constant 0 : i32
    %c0_i32_0 = arith.constant 0 : i32
    %c0_i32_1 = arith.constant 0 : i32
    return %c0_i32, %c0_i32_0 : i32, i32
  }
  func.func @transform_5(%arg0: i32) -> (i32, i32) {
    %c0_i32 = arith.constant 0 : i32
    %c0_i32_0 = arith.constant 0 : i32
    return %c0_i32, %arg0 : i32, i32
  }
}

</mosaic_0001>

<bundles_post_ra>
// kernel: tpu_custom_call.1
= control target key start
LH: loop header
LB: loop body
LE: loop exit
PB: predicated region body
PF: predicated region fallthrough
CT: control target
= control target key end

     0   :  { %10 = vsyncpa [#allocation3], 0  ;;  %s284_s0 = inlined_call_operand.vmem [shape: f32[8,32], index: 0, kind: input, shape index: {}]   ;;  %s285_s1 = inlined_call_operand.hbm [shape: bf16[32,128], index: 1, kind: input, shape index: {}]   ;;  %s286_s2 = inlined_call_operand.vmem [shape: f32[1,128], index: 2, kind: input, shape index: {}]   ;;  %s287_s3 = inlined_call_operand.hbm [shape: bf16[8,128], index: 3, kind: input, shape index: {}]   ;;  %s288_s4 = inlined_call_operand.vmem [shape: f32[8,1], index: 4, kind: input, shape index: {}]   ;;  %s289_s5 = inlined_call_operand.hbm [shape: f32[8,8], index: 5, kind: output, shape index: {}]  }
   0x1   :  { %11 = vsyncpa [#allocation6], 0 }
   0x2   :  { %12 = vsyncpa [#allocation4], 0  ;;  %s19_s20 = sshll.u32 %s285_s1, 4  ;;  %s230_s21 = smov [#allocation2]   ;;  %s20_s20 = int_to_ptr.hbm [resolvable:$true] %s19_s20 }
   0x3   :  { %s21_s22 = sshll.u32 %s230_s21, 4  ;;  %s35_s25 = sshll.u32 %s287_s3, 4  ;;  %s22_s22 = int_to_ptr.vmem [resolvable:$true] %s21_s22  ;;  %s36_s25 = int_to_ptr.hbm [resolvable:$true] %s35_s25 }
   0x4   :  { %s231_s26 = smov 64   ;;  %s232_s27 = smov 4  }
   0x5   :  { %27 = dma.hbm_to_vmem [thread:$0]  %s20_s20, 256, %s22_s22, [#allocation3], %s231_s26, %s231_s26, %s232_s27  }
   0x6   :  { %s233_s28 = smov [#allocation5]  }
   0x7   :  { %s37_s29 = sshll.u32 %s233_s28, 4  ;;  %s38_s29 = int_to_ptr.vmem [resolvable:$true] %s37_s29 }
   0x8   :  { %40 = dma.hbm_to_vmem [thread:$0]  %s36_s25, 64, %s38_s29, [#allocation6]  }
   0x9   :  { %224 = dma.done.wait [#allocation3], 256  }
   0xa   :  { %225 = vsyncadd [#allocation3], 4294967040 }
   0xb   :  { %226 = dma.done.wait [#allocation6], 64  }
   0xc   :  { %227 = vsyncadd [#allocation6], 4294967232  ;;  %v143_v0 = vld [vmem:[#allocation2 + $0x8] sm:$0xff]  ;;  %v142_v1 = vld [vmem:[#allocation2] sm:$0xff]  ;;  %vm74_vm0 = vcmask 261120   ;;  %v234_v5 = vmov 0  }
   0xd   :  { %84 = vmatpush.bf16.msra.mxu0 %v143_v0  ;;  %v52_v2 = vld [vmem:[%s284_s0] sm:$0xff]  ;;  %150 = vset.pattern.permute.xlu0 %v234_v5  ;;  %v92_v12 = vld [vmem:[#allocation5] sm:$0xf]  ;;  %s235_s0 = smov [#allocation7]   ;;  %s122_s11 = sshll.u32 %s289_s5, 4  ;;  %vm113_vm1 = vcmask 64512   ;;  %s123_s11 = int_to_ptr.hbm [resolvable:$true] %s122_s11 }
   0xe   :  { %v53_v3 = vpack.c.bf16 %v52_v2, %v52_v2  ;;  %v94_v4 = vld [vmem:[%s288_s4] sm:$0xff]  ;;  %s120_s9 = sshll.u32 %s235_s0, 4  ;;  %s121_s9 = int_to_ptr.vmem [resolvable:$true] %s120_s9 }
   0xf   :  { %97 = vperm.xlu0 %150, %v94_v4   ;;  %v151_v6 = vld [vmem:[%s286_s2] ss:$0 sm:$0xff] }
  0x11   :  { %85 = vmatpush.bf16.msra.mxu0 %v142_v1 }
  0x14   :  { %141 = vmatmul.msk.bf16.vlgmr.msra.gmra.mxu0 %vm74_vm0, %v53_v3 }
  0x81   :  { %v98_v13 = vpop.permute.xlu0 %97 }
  0x91   :  { %v87_v7 = vpop.f32.mrf.mxu0 }
  0x92   :  { %v88_v8 = vadd.f32 %v151_v6, %v87_v7 }
  0x94   :  { %v91_v9 = vmax.f32 %v88_v8, 0.0 }
  0x96   :  { %v93_v10 = vpack.c.bf16 %v91_v9, %v91_v9 }
  0x98   :  { %107 = vmatpush.bf16.xpose.msra.mxu1 %v93_v10 }
  0x99   :  { %v89_v11 = vpop.f32.mrf.mxu0 }
  0x9f   :  { %108 = vmatmul.bf16.vlgmr.msra.gmra.mxu1 %v92_v12 }
 0x11c   :  { %v109_v14 = vpop.f32.mrf.mxu1 }
 0x11d   :  { %v110_v15 = vadd.f32 %v109_v14, %v98_v13 }
 0x11f   :  { %114 = vst.msk [vmem:[#allocation7] sm:$0xff] %vm113_vm1, %v110_v15 }
 0x120   :  { %125 = dma.vmem_to_hbm [thread:$0]  %s121_s9, 128, %s123_s11, [#allocation4]  }
 0x124   :  { %v111_v16 = vpop.f32.mrf.mxu1 }
 0x125   :  { %228 = dma.done.wait [#allocation4], 128  }
 0x126   :  { %229 = vsyncadd [#allocation4], 4294967168 }
 0x127   :  { %130 = vsyncpa [#allocation3], 1 }
 0x128   :  { %131 = vsyncpa [#allocation6], 1 }
 0x129   :  { %132 = vsyncpa [#allocation4], 1 }

</bundles_post_ra>
